<compile_context>
chip_gen: v5e
topology: v5e:2x2
jax: 0.10.0
libtpu: 0.0.40
codegen_flags: <defaults>
</compile_context>

<pallas_src>
import jax
import jax.numpy as jnp
from jax.experimental import pallas as pl
from jax.experimental.pallas import tpu as pltpu


def rnn_model_kernel(tok_ref, h0_ref, wih_ref, whh_ref, b_ref, wd_ref, bd_ref,
                     logits_ref, hfin_ref):
    """Whole-forward kernel.

    tok_ref    : SMEM (seq*batch,) int32 token ids, time-major flattened (t*batch + b).
    h0_ref     : VMEM (1, batch, hidden)   initial hidden state.
    wih_ref    : VMEM (vocab, hidden)      W_ih^T  (row v = input proj of token v).
    whh_ref    : VMEM (hidden, hidden)     W_hh^T.
    b_ref      : VMEM (1, hidden)          b_ih + b_hh (pre-summed in wrapper).
    wd_ref     : VMEM (hidden, vocab)      W_dense^T.
    bd_ref     : VMEM (1, vocab)           b_dense.
    logits_ref : VMEM (seq*batch, vocab)   output (matches dense(Y.view(-1, H))).
    hfin_ref   : VMEM (1, batch, hidden)   final state output.
    """
    batch = hfin_ref.shape[1]
    seq = logits_ref.shape[0] // batch

    whh = whh_ref[...]
    bias = b_ref[...]

    h = h0_ref[0]                                   # (batch, hidden), vreg-resident carry
    hs = []
    # Fully unrolled time recurrence (seq is small -> full LLO scheduler visibility).
    # TODO(synk): for long sequences switch to lax.fori_loop + a VMEM scratch for Y.
    for t in range(seq):
        # one_hot(x_t) @ W_ih^T is just a row gather of W_ih^T at the token ids.
        rows = [wih_ref[pl.ds(tok_ref[t * batch + b_], 1), :] for b_ in range(batch)]
        xw = jnp.concatenate(rows, axis=0)          # (batch, hidden)
        h = jnp.tanh(
            xw + jnp.dot(h, whh, preferred_element_type=jnp.float32) + bias
        )
        hs.append(h)

    # Final state written once (resident output block).
    hfin_ref[0] = h

    # Dense projection hoisted out of the recurrence: one batched, lane-dense matmul.
    y_all = jnp.concatenate(hs, axis=0)             # (seq*batch, hidden)
    logits_ref[...] = (
        jnp.dot(y_all, wd_ref[...], preferred_element_type=jnp.float32) + bd_ref[...]
    )


def rnn_model_forward(tokens, h0, params):
    """tokens: (batch, seq) int32, h0: (1, batch, hidden).  Returns (output, state)."""
    wih_t, whh_t, bih, bhh, wd_t, bd = params
    batch, seq = tokens.shape
    hidden = h0.shape[-1]
    vocab = wih_t.shape[0]

    # Time-major flattened token ids (index t*batch + b), placed in SMEM.
    tok_tm = jnp.transpose(tokens, (1, 0)).reshape(seq * batch).astype(jnp.int32)
    # Pre-sum the two RNN biases (identical math, one fewer add per step).
    b_comb = (bih + bhh).astype(jnp.float32)

    logits, h_fin = pl.pallas_call(
        rnn_model_kernel,
        out_shape=(
            jax.ShapeDtypeStruct((seq * batch, vocab), jnp.float32),
            jax.ShapeDtypeStruct((1, batch, hidden), jnp.float32),
        ),
        in_specs=[
            pl.BlockSpec(memory_space=pltpu.MemorySpace.SMEM),   # token ids
            pl.BlockSpec(memory_space=pltpu.MemorySpace.VMEM),   # h0
            pl.BlockSpec(memory_space=pltpu.MemorySpace.VMEM),   # W_ih^T
            pl.BlockSpec(memory_space=pltpu.MemorySpace.VMEM),   # W_hh^T
            pl.BlockSpec(memory_space=pltpu.MemorySpace.VMEM),   # b_ih + b_hh
            pl.BlockSpec(memory_space=pltpu.MemorySpace.VMEM),   # W_dense^T
            pl.BlockSpec(memory_space=pltpu.MemorySpace.VMEM),   # b_dense
        ],
        out_specs=(
            pl.BlockSpec(memory_space=pltpu.MemorySpace.VMEM),   # logits
            pl.BlockSpec(memory_space=pltpu.MemorySpace.VMEM),   # final state
        ),
    )(tok_tm, h0, wih_t, whh_t, b_comb, wd_t, bd)

    return logits, h_fin


def reference_forward(tokens, h0, params):
    """Plain-JAX reference mirroring the PyTorch module."""
    wih_t, whh_t, bih, bhh, wd_t, bd = params
    batch, seq = tokens.shape
    vocab = wih_t.shape[0]
    h = h0[0]
    ys = []
    for t in range(seq):
        x_oh = jax.nn.one_hot(tokens[:, t], vocab, dtype=jnp.float32)
        h = jnp.tanh(x_oh @ wih_t + bih + h @ whh_t + bhh)
        ys.append(h)
    y = jnp.stack(ys, axis=0)                       # (seq, batch, hidden)
    out = y.reshape(-1, y.shape[-1]) @ wd_t + bd    # (seq*batch, vocab)
    return out, h[None]


if __name__ == "__main__":
    vocab_size = 32
    hidden_size = 32
    batch = 4
    seq = 8

    key = jax.random.PRNGKey(0)
    ks = jax.random.split(key, 8)

    # Deterministic synthetic parameters (shapes from nn.RNN(vocab, hidden) + nn.Linear(hidden, vocab)).
    wih_t = (jax.random.normal(ks[0], (vocab_size, hidden_size)) * 0.1).astype(jnp.float32)  # W_ih^T
    whh_t = (jax.random.normal(ks[1], (hidden_size, hidden_size)) * 0.1).astype(jnp.float32)  # W_hh^T
    bih = (jax.random.normal(ks[2], (1, hidden_size)) * 0.1).astype(jnp.float32)
    bhh = (jax.random.normal(ks[3], (1, hidden_size)) * 0.1).astype(jnp.float32)
    wd_t = (jax.random.normal(ks[4], (hidden_size, vocab_size)) * 0.1).astype(jnp.float32)    # W_dense^T
    bd = (jax.random.normal(ks[5], (1, vocab_size)) * 0.1).astype(jnp.float32)
    params = (wih_t, whh_t, bih, bhh, wd_t, bd)

    tokens = jax.random.randint(ks[6], (batch, seq), 0, vocab_size, dtype=jnp.int32)
    h0 = (jax.random.normal(ks[7], (1, batch, hidden_size)) * 0.1).astype(jnp.float32)

    out, state = jax.block_until_ready(rnn_model_forward(tokens, h0, params))

    ref_out, ref_state = reference_forward(tokens, h0, params)
    assert out.shape == (seq * batch, vocab_size)
    assert state.shape == (1, batch, hidden_size)
    assert jnp.allclose(out, ref_out, atol=1e-4, rtol=1e-4)
    assert jnp.allclose(state, ref_state, atol=1e-4, rtol=1e-4)

    print("KERNEL_OK")
</pallas_src>

<mosaic_0001>
module attributes {stable_mosaic.version = 11 : i64} {
  func.func @rnn_model_kernel(%arg0: memref<32xi32, #tpu.memory_space<smem>>, %arg1: memref<1x4x32xf32, #tpu.memory_space<vmem>>, %arg2: memref<32x32xf32, #tpu.memory_space<vmem>>, %arg3: memref<32x32xf32, #tpu.memory_space<vmem>>, %arg4: memref<1x32xf32, #tpu.memory_space<vmem>>, %arg5: memref<32x32xf32, #tpu.memory_space<vmem>>, %arg6: memref<1x32xf32, #tpu.memory_space<vmem>>, %arg7: memref<32x32xf32, #tpu.memory_space<vmem>>, %arg8: memref<1x4x32xf32, #tpu.memory_space<vmem>>) attributes {dimension_semantics = [], scalar_prefetch = 0 : i64, scratch_operands = 0 : i64, tpu.core_type = #tpu.core_type<tc>} {
    %c0 = arith.constant 0 : index
    %c0_0 = arith.constant 0 : index
    %0 = vector.load %arg3[%c0, %c0_0] : memref<32x32xf32, #tpu.memory_space<vmem>>, vector<32x32xf32>
    %c0_1 = arith.constant 0 : index
    %c0_2 = arith.constant 0 : index
    %1 = vector.load %arg4[%c0_1, %c0_2] : memref<1x32xf32, #tpu.memory_space<vmem>>, vector<1x32xf32>
    %c0_3 = arith.constant 0 : index
    %c0_4 = arith.constant 0 : index
    %c0_5 = arith.constant 0 : index
    %2 = vector.load %arg1[%c0_3, %c0_4, %c0_5] : memref<1x4x32xf32, #tpu.memory_space<vmem>>, vector<1x4x32xf32>
    %3 = vector.shape_cast %2 : vector<1x4x32xf32> to vector<4x32xf32>
    %c0_6 = arith.constant 0 : index
    %4 = memref.load %arg0[%c0_6] : memref<32xi32, #tpu.memory_space<smem>>
    %5 = arith.index_cast %4 : i32 to index
    %c0_7 = arith.constant 0 : index
    %6 = vector.load %arg2[%5, %c0_7] : memref<32x32xf32, #tpu.memory_space<vmem>>, vector<1x32xf32>
    %c1 = arith.constant 1 : index
    %7 = memref.load %arg0[%c1] : memref<32xi32, #tpu.memory_space<smem>>
    %8 = arith.index_cast %7 : i32 to index
    %c0_8 = arith.constant 0 : index
    %9 = vector.load %arg2[%8, %c0_8] : memref<32x32xf32, #tpu.memory_space<vmem>>, vector<1x32xf32>
    %c2 = arith.constant 2 : index
    %10 = memref.load %arg0[%c2] : memref<32xi32, #tpu.memory_space<smem>>
    %11 = arith.index_cast %10 : i32 to index
    %c0_9 = arith.constant 0 : index
    %12 = vector.load %arg2[%11, %c0_9] : memref<32x32xf32, #tpu.memory_space<vmem>>, vector<1x32xf32>
    %c3 = arith.constant 3 : index
    %13 = memref.load %arg0[%c3] : memref<32xi32, #tpu.memory_space<smem>>
    %14 = arith.index_cast %13 : i32 to index
    %c0_10 = arith.constant 0 : index
    %15 = vector.load %arg2[%14, %c0_10] : memref<32x32xf32, #tpu.memory_space<vmem>>, vector<1x32xf32>
    %16 = tpu.concatenate %6, %9, %12, %15 in 0 : vector<1x32xf32>, vector<1x32xf32>, vector<1x32xf32>, vector<1x32xf32> -> vector<4x32xf32>
    %cst = arith.constant dense<0.000000e+00> : vector<4x32xf32>
    %17 = tpu.matmul %3, %0, %cst {dimension_numbers = #tpu.dot_dimension_numbers<[1], [0], [0], [1], [0, 0, 1, 1], [], []>} : vector<4x32xf32>, vector<32x32xf32>, vector<4x32xf32> -> vector<4x32xf32>
    %18 = arith.addf %16, %17 : vector<4x32xf32>
    %19 = vector.broadcast %1 : vector<1x32xf32> to vector<4x32xf32>
    %20 = arith.addf %18, %19 : vector<4x32xf32>
    %21 = math.tanh %20 : vector<4x32xf32>
    %c4 = arith.constant 4 : index
    %22 = memref.load %arg0[%c4] : memref<32xi32, #tpu.memory_space<smem>>
    %23 = arith.index_cast %22 : i32 to index
    %c0_11 = arith.constant 0 : index
    %24 = vector.load %arg2[%23, %c0_11] : memref<32x32xf32, #tpu.memory_space<vmem>>, vector<1x32xf32>
    %c5 = arith.constant 5 : index
    %25 = memref.load %arg0[%c5] : memref<32xi32, #tpu.memory_space<smem>>
    %26 = arith.index_cast %25 : i32 to index
    %c0_12 = arith.constant 0 : index
    %27 = vector.load %arg2[%26, %c0_12] : memref<32x32xf32, #tpu.memory_space<vmem>>, vector<1x32xf32>
    %c6 = arith.constant 6 : index
    %28 = memref.load %arg0[%c6] : memref<32xi32, #tpu.memory_space<smem>>
    %29 = arith.index_cast %28 : i32 to index
    %c0_13 = arith.constant 0 : index
    %30 = vector.load %arg2[%29, %c0_13] : memref<32x32xf32, #tpu.memory_space<vmem>>, vector<1x32xf32>
    %c7 = arith.constant 7 : index
    %31 = memref.load %arg0[%c7] : memref<32xi32, #tpu.memory_space<smem>>
    %32 = arith.index_cast %31 : i32 to index
    %c0_14 = arith.constant 0 : index
    %33 = vector.load %arg2[%32, %c0_14] : memref<32x32xf32, #tpu.memory_space<vmem>>, vector<1x32xf32>
    %34 = tpu.concatenate %24, %27, %30, %33 in 0 : vector<1x32xf32>, vector<1x32xf32>, vector<1x32xf32>, vector<1x32xf32> -> vector<4x32xf32>
    %cst_15 = arith.constant dense<0.000000e+00> : vector<4x32xf32>
    %35 = tpu.matmul %21, %0, %cst_15 {dimension_numbers = #tpu.dot_dimension_numbers<[1], [0], [0], [1], [0, 0, 1, 1], [], []>} : vector<4x32xf32>, vector<32x32xf32>, vector<4x32xf32> -> vector<4x32xf32>
    %36 = arith.addf %34, %35 : vector<4x32xf32>
    %37 = vector.broadcast %1 : vector<1x32xf32> to vector<4x32xf32>
    %38 = arith.addf %36, %37 : vector<4x32xf32>
    %39 = math.tanh %38 : vector<4x32xf32>
    %c8 = arith.constant 8 : index
    %40 = memref.load %arg0[%c8] : memref<32xi32, #tpu.memory_space<smem>>
    %41 = arith.index_cast %40 : i32 to index
    %c0_16 = arith.constant 0 : index
    %42 = vector.load %arg2[%41, %c0_16] : memref<32x32xf32, #tpu.memory_space<vmem>>, vector<1x32xf32>
    %c9 = arith.constant 9 : index
    %43 = memref.load %arg0[%c9] : memref<32xi32, #tpu.memory_space<smem>>
    %44 = arith.index_cast %43 : i32 to index
    %c0_17 = arith.constant 0 : index
    %45 = vector.load %arg2[%44, %c0_17] : memref<32x32xf32, #tpu.memory_space<vmem>>, vector<1x32xf32>
    %c10 = arith.constant 10 : index
    %46 = memref.load %arg0[%c10] : memref<32xi32, #tpu.memory_space<smem>>
    %47 = arith.index_cast %46 : i32 to index
    %c0_18 = arith.constant 0 : index
    %48 = vector.load %arg2[%47, %c0_18] : memref<32x32xf32, #tpu.memory_space<vmem>>, vector<1x32xf32>
    %c11 = arith.constant 11 : index
    %49 = memref.load %arg0[%c11] : memref<32xi32, #tpu.memory_space<smem>>
    %50 = arith.index_cast %49 : i32 to index
    %c0_19 = arith.constant 0 : index
    %51 = vector.load %arg2[%50, %c0_19] : memref<32x32xf32, #tpu.memory_space<vmem>>, vector<1x32xf32>
    %52 = tpu.concatenate %42, %45, %48, %51 in 0 : vector<1x32xf32>, vector<1x32xf32>, vector<1x32xf32>, vector<1x32xf32> -> vector<4x32xf32>
    %cst_20 = arith.constant dense<0.000000e+00> : vector<4x32xf32>
    %53 = tpu.matmul %39, %0, %cst_20 {dimension_numbers = #tpu.dot_dimension_numbers<[1], [0], [0], [1], [0, 0, 1, 1], [], []>} : vector<4x32xf32>, vector<32x32xf32>, vector<4x32xf32> -> vector<4x32xf32>
    %54 = arith.addf %52, %53 : vector<4x32xf32>
    %55 = vector.broadcast %1 : vector<1x32xf32> to vector<4x32xf32>
    %56 = arith.addf %54, %55 : vector<4x32xf32>
    %57 = math.tanh %56 : vector<4x32xf32>
    %c12 = arith.constant 12 : index
    %58 = memref.load %arg0[%c12] : memref<32xi32, #tpu.memory_space<smem>>
    %59 = arith.index_cast %58 : i32 to index
    %c0_21 = arith.constant 0 : index
    %60 = vector.load %arg2[%59, %c0_21] : memref<32x32xf32, #tpu.memory_space<vmem>>, vector<1x32xf32>
    %c13 = arith.constant 13 : index
    %61 = memref.load %arg0[%c13] : memref<32xi32, #tpu.memory_space<smem>>
    %62 = arith.index_cast %61 : i32 to index
    %c0_22 = arith.constant 0 : index
    %63 = vector.load %arg2[%62, %c0_22] : memref<32x32xf32, #tpu.memory_space<vmem>>, vector<1x32xf32>
    %c14 = arith.constant 14 : index
    %64 = memref.load %arg0[%c14] : memref<32xi32, #tpu.memory_space<smem>>
    %65 = arith.index_cast %64 : i32 to index
    %c0_23 = arith.constant 0 : index
    %66 = vector.load %arg2[%65, %c0_23] : memref<32x32xf32, #tpu.memory_space<vmem>>, vector<1x32xf32>
    %c15 = arith.constant 15 : index
    %67 = memref.load %arg0[%c15] : memref<32xi32, #tpu.memory_space<smem>>
    %68 = arith.index_cast %67 : i32 to index
    %c0_24 = arith.constant 0 : index
    %69 = vector.load %arg2[%68, %c0_24] : memref<32x32xf32, #tpu.memory_space<vmem>>, vector<1x32xf32>
    %70 = tpu.concatenate %60, %63, %66, %69 in 0 : vector<1x32xf32>, vector<1x32xf32>, vector<1x32xf32>, vector<1x32xf32> -> vector<4x32xf32>
    %cst_25 = arith.constant dense<0.000000e+00> : vector<4x32xf32>
    %71 = tpu.matmul %57, %0, %cst_25 {dimension_numbers = #tpu.dot_dimension_numbers<[1], [0], [0], [1], [0, 0, 1, 1], [], []>} : vector<4x32xf32>, vector<32x32xf32>, vector<4x32xf32> -> vector<4x32xf32>
    %72 = arith.addf %70, %71 : vector<4x32xf32>
    %73 = vector.broadcast %1 : vector<1x32xf32> to vector<4x32xf32>
    %74 = arith.addf %72, %73 : vector<4x32xf32>
    %75 = math.tanh %74 : vector<4x32xf32>
    %c16 = arith.constant 16 : index
    %76 = memref.load %arg0[%c16] : memref<32xi32, #tpu.memory_space<smem>>
    %77 = arith.index_cast %76 : i32 to index
    %c0_26 = arith.constant 0 : index
    %78 = vector.load %arg2[%77, %c0_26] : memref<32x32xf32, #tpu.memory_space<vmem>>, vector<1x32xf32>
    %c17 = arith.constant 17 : index
    %79 = memref.load %arg0[%c17] : memref<32xi32, #tpu.memory_space<smem>>
    %80 = arith.index_cast %79 : i32 to index
    %c0_27 = arith.constant 0 : index
    %81 = vector.load %arg2[%80, %c0_27] : memref<32x32xf32, #tpu.memory_space<vmem>>, vector<1x32xf32>
    %c18 = arith.constant 18 : index
    %82 = memref.load %arg0[%c18] : memref<32xi32, #tpu.memory_space<smem>>
    %83 = arith.index_cast %82 : i32 to index
    %c0_28 = arith.constant 0 : index
    %84 = vector.load %arg2[%83, %c0_28] : memref<32x32xf32, #tpu.memory_space<vmem>>, vector<1x32xf32>
    %c19 = arith.constant 19 : index
    %85 = memref.load %arg0[%c19] : memref<32xi32, #tpu.memory_space<smem>>
    %86 = arith.index_cast %85 : i32 to index
    %c0_29 = arith.constant 0 : index
    %87 = vector.load %arg2[%86, %c0_29] : memref<32x32xf32, #tpu.memory_space<vmem>>, vector<1x32xf32>
    %88 = tpu.concatenate %78, %81, %84, %87 in 0 : vector<1x32xf32>, vector<1x32xf32>, vector<1x32xf32>, vector<1x32xf32> -> vector<4x32xf32>
    %cst_30 = arith.constant dense<0.000000e+00> : vector<4x32xf32>
    %89 = tpu.matmul %75, %0, %cst_30 {dimension_numbers = #tpu.dot_dimension_numbers<[1], [0], [0], [1], [0, 0, 1, 1], [], []>} : vector<4x32xf32>, vector<32x32xf32>, vector<4x32xf32> -> vector<4x32xf32>
    %90 = arith.addf %88, %89 : vector<4x32xf32>
    %91 = vector.broadcast %1 : vector<1x32xf32> to vector<4x32xf32>
    %92 = arith.addf %90, %91 : vector<4x32xf32>
    %93 = math.tanh %92 : vector<4x32xf32>
    %c20 = arith.constant 20 : index
    %94 = memref.load %arg0[%c20] : memref<32xi32, #tpu.memory_space<smem>>
    %95 = arith.index_cast %94 : i32 to index
    %c0_31 = arith.constant 0 : index
    %96 = vector.load %arg2[%95, %c0_31] : memref<32x32xf32, #tpu.memory_space<vmem>>, vector<1x32xf32>
    %c21 = arith.constant 21 : index
    %97 = memref.load %arg0[%c21] : memref<32xi32, #tpu.memory_space<smem>>
    %98 = arith.index_cast %97 : i32 to index
    %c0_32 = arith.constant 0 : index
    %99 = vector.load %arg2[%98, %c0_32] : memref<32x32xf32, #tpu.memory_space<vmem>>, vector<1x32xf32>
    %c22 = arith.constant 22 : index
    %100 = memref.load %arg0[%c22] : memref<32xi32, #tpu.memory_space<smem>>
    %101 = arith.index_cast %100 : i32 to index
    %c0_33 = arith.constant 0 : index
    %102 = vector.load %arg2[%101, %c0_33] : memref<32x32xf32, #tpu.memory_space<vmem>>, vector<1x32xf32>
    %c23 = arith.constant 23 : index
    %103 = memref.load %arg0[%c23] : memref<32xi32, #tpu.memory_space<smem>>
    %104 = arith.index_cast %103 : i32 to index
    %c0_34 = arith.constant 0 : index
    %105 = vector.load %arg2[%104, %c0_34] : memref<32x32xf32, #tpu.memory_space<vmem>>, vector<1x32xf32>
    %106 = tpu.concatenate %96, %99, %102, %105 in 0 : vector<1x32xf32>, vector<1x32xf32>, vector<1x32xf32>, vector<1x32xf32> -> vector<4x32xf32>
    %cst_35 = arith.constant dense<0.000000e+00> : vector<4x32xf32>
    %107 = tpu.matmul %93, %0, %cst_35 {dimension_numbers = #tpu.dot_dimension_numbers<[1], [0], [0], [1], [0, 0, 1, 1], [], []>} : vector<4x32xf32>, vector<32x32xf32>, vector<4x32xf32> -> vector<4x32xf32>
    %108 = arith.addf %106, %107 : vector<4x32xf32>
    %109 = vector.broadcast %1 : vector<1x32xf32> to vector<4x32xf32>
    %110 = arith.addf %108, %109 : vector<4x32xf32>
    %111 = math.tanh %110 : vector<4x32xf32>
    %c24 = arith.constant 24 : index
    %112 = memref.load %arg0[%c24] : memref<32xi32, #tpu.memory_space<smem>>
    %113 = arith.index_cast %112 : i32 to index
    %c0_36 = arith.constant 0 : index
    %114 = vector.load %arg2[%113, %c0_36] : memref<32x32xf32, #tpu.memory_space<vmem>>, vector<1x32xf32>
    %c25 = arith.constant 25 : index
    %115 = memref.load %arg0[%c25] : memref<32xi32, #tpu.memory_space<smem>>
    %116 = arith.index_cast %115 : i32 to index
    %c0_37 = arith.constant 0 : index
    %117 = vector.load %arg2[%116, %c0_37] : memref<32x32xf32, #tpu.memory_space<vmem>>, vector<1x32xf32>
    %c26 = arith.constant 26 : index
    %118 = memref.load %arg0[%c26] : memref<32xi32, #tpu.memory_space<smem>>
    %119 = arith.index_cast %118 : i32 to index
    %c0_38 = arith.constant 0 : index
    %120 = vector.load %arg2[%119, %c0_38] : memref<32x32xf32, #tpu.memory_space<vmem>>, vector<1x32xf32>
    %c27 = arith.constant 27 : index
    %121 = memref.load %arg0[%c27] : memref<32xi32, #tpu.memory_space<smem>>
    %122 = arith.index_cast %121 : i32 to index
    %c0_39 = arith.constant 0 : index
    %123 = vector.load %arg2[%122, %c0_39] : memref<32x32xf32, #tpu.memory_space<vmem>>, vector<1x32xf32>
    %124 = tpu.concatenate %114, %117, %120, %123 in 0 : vector<1x32xf32>, vector<1x32xf32>, vector<1x32xf32>, vector<1x32xf32> -> vector<4x32xf32>
    %cst_40 = arith.constant dense<0.000000e+00> : vector<4x32xf32>
    %125 = tpu.matmul %111, %0, %cst_40 {dimension_numbers = #tpu.dot_dimension_numbers<[1], [0], [0], [1], [0, 0, 1, 1], [], []>} : vector<4x32xf32>, vector<32x32xf32>, vector<4x32xf32> -> vector<4x32xf32>
    %126 = arith.addf %124, %125 : vector<4x32xf32>
    %127 = vector.broadcast %1 : vector<1x32xf32> to vector<4x32xf32>
    %128 = arith.addf %126, %127 : vector<4x32xf32>
    %129 = math.tanh %128 : vector<4x32xf32>
    %c28 = arith.constant 28 : index
    %130 = memref.load %arg0[%c28] : memref<32xi32, #tpu.memory_space<smem>>
    %131 = arith.index_cast %130 : i32 to index
    %c0_41 = arith.constant 0 : index
    %132 = vector.load %arg2[%131, %c0_41] : memref<32x32xf32, #tpu.memory_space<vmem>>, vector<1x32xf32>
    %c29 = arith.constant 29 : index
    %133 = memref.load %arg0[%c29] : memref<32xi32, #tpu.memory_space<smem>>
    %134 = arith.index_cast %133 : i32 to index
    %c0_42 = arith.constant 0 : index
    %135 = vector.load %arg2[%134, %c0_42] : memref<32x32xf32, #tpu.memory_space<vmem>>, vector<1x32xf32>
    %c30 = arith.constant 30 : index
    %136 = memref.load %arg0[%c30] : memref<32xi32, #tpu.memory_space<smem>>
    %137 = arith.index_cast %136 : i32 to index
    %c0_43 = arith.constant 0 : index
    %138 = vector.load %arg2[%137, %c0_43] : memref<32x32xf32, #tpu.memory_space<vmem>>, vector<1x32xf32>
    %c31 = arith.constant 31 : index
    %139 = memref.load %arg0[%c31] : memref<32xi32, #tpu.memory_space<smem>>
    %140 = arith.index_cast %139 : i32 to index
    %c0_44 = arith.constant 0 : index
    %141 = vector.load %arg2[%140, %c0_44] : memref<32x32xf32, #tpu.memory_space<vmem>>, vector<1x32xf32>
    %142 = tpu.concatenate %132, %135, %138, %141 in 0 : vector<1x32xf32>, vector<1x32xf32>, vector<1x32xf32>, vector<1x32xf32> -> vector<4x32xf32>
    %cst_45 = arith.constant dense<0.000000e+00> : vector<4x32xf32>
    %143 = tpu.matmul %129, %0, %cst_45 {dimension_numbers = #tpu.dot_dimension_numbers<[1], [0], [0], [1], [0, 0, 1, 1], [], []>} : vector<4x32xf32>, vector<32x32xf32>, vector<4x32xf32> -> vector<4x32xf32>
    %144 = arith.addf %142, %143 : vector<4x32xf32>
    %145 = vector.broadcast %1 : vector<1x32xf32> to vector<4x32xf32>
    %146 = arith.addf %144, %145 : vector<4x32xf32>
    %147 = math.tanh %146 : vector<4x32xf32>
    %c0_46 = arith.constant 0 : index
    %c0_47 = arith.constant 0 : index
    %c0_48 = arith.constant 0 : index
    %148 = vector.load %arg8[%c0_46, %c0_47, %c0_48] : memref<1x4x32xf32, #tpu.memory_space<vmem>>, vector<1x4x32xf32>
    %149 = vector.shape_cast %148 : vector<1x4x32xf32> to vector<4x32xf32>
    %150 = vector.shape_cast %147 : vector<4x32xf32> to vector<1x4x32xf32>
    tpu.vector_store %arg8[%c0_46, %c0_47, %c0_48], %150 {strides = array<i32>} : memref<1x4x32xf32, #tpu.memory_space<vmem>>, vector<1x4x32xf32>,
    %151 = tpu.concatenate %21, %39, %57, %75, %93, %111, %129, %147 in 0 : vector<4x32xf32>, vector<4x32xf32>, vector<4x32xf32>, vector<4x32xf32>, vector<4x32xf32>, vector<4x32xf32>, vector<4x32xf32>, vector<4x32xf32> -> vector<32x32xf32>
    %c0_49 = arith.constant 0 : index
    %c0_50 = arith.constant 0 : index
    %152 = vector.load %arg5[%c0_49, %c0_50] : memref<32x32xf32, #tpu.memory_space<vmem>>, vector<32x32xf32>
    %cst_51 = arith.constant dense<0.000000e+00> : vector<32x32xf32>
    %153 = tpu.matmul %151, %152, %cst_51 {dimension_numbers = #tpu.dot_dimension_numbers<[1], [0], [0], [1], [0, 0, 1, 1], [], []>} : vector<32x32xf32>, vector<32x32xf32>, vector<32x32xf32> -> vector<32x32xf32>
    %c0_52 = arith.constant 0 : index
    %c0_53 = arith.constant 0 : index
    %154 = vector.load %arg6[%c0_52, %c0_53] : memref<1x32xf32, #tpu.memory_space<vmem>>, vector<1x32xf32>
    %155 = vector.broadcast %154 : vector<1x32xf32> to vector<32x32xf32>
    %156 = arith.addf %153, %155 : vector<32x32xf32>
    %c0_54 = arith.constant 0 : index
    %c0_55 = arith.constant 0 : index
    %157 = vector.load %arg7[%c0_54, %c0_55] : memref<32x32xf32, #tpu.memory_space<vmem>>, vector<32x32xf32>
    tpu.vector_store %arg7[%c0_54, %c0_55], %156 {strides = array<i32>} : memref<32x32xf32, #tpu.memory_space<vmem>>, vector<32x32xf32>,
    return
  }
}

</mosaic_0001>

<bundles_post_ra>
// kernel: tpu_custom_call.1
= control target key start
LH: loop header
LB: loop body
LE: loop exit
PB: predicated region body
PF: predicated region fallthrough
CT: control target
= control target key end

     0   :  { %14 = vsyncpa [#allocation5], 0  ;;  %s1099_s0 = inlined_call_operand.hbm [shape: s32[32], index: 0, kind: input, shape index: {}]   ;;  %s1100_s1 = inlined_call_operand.hbm [shape: f32[1,4,32], index: 1, kind: input, shape index: {}]   ;;  %s1101_s2 = inlined_call_operand.hbm [shape: f32[32,32], index: 2, kind: input, shape index: {}]   ;;  %s1102_s3 = inlined_call_operand.hbm [shape: f32[32,32], index: 3, kind: input, shape index: {}]   ;;  %s1103_s4 = inlined_call_operand.vmem [shape: f32[1,32], index: 4, kind: input, shape index: {}]   ;;  %s1104_s5 = inlined_call_operand.hbm [shape: f32[32,32], index: 5, kind: input, shape index: {}]   ;;  %s1105_s6 = inlined_call_operand.vmem [shape: f32[1,32], index: 6, kind: input, shape index: {}]   ;;  %s1106_s7 = inlined_call_operand.hbm [shape: f32[32,32], index: 7, kind: output, shape index: {0}]   ;;  %s1107_s8 = inlined_call_operand.hbm [shape: f32[1,4,32], index: 8, kind: output, shape index: {1}]  }
   0x1   :  { %15 = vsyncpa [#allocation3], 0 }
   0x2   :  { %16 = vsyncpa [#allocation8], 0 }
   0x3   :  { %17 = vsyncpa [#allocation11], 0 }
   0x4   :  { %18 = vsyncpa [#allocation4], 0  ;;  %s44_s29 = sshll.u32 %s1101_s2, 4  ;;  %s45_s29 = int_to_ptr.hbm [resolvable:$true] %s44_s29 }
   0x5   :  { %19 = vsyncpa [#allocation14], 0  ;;  %s898_s30 = smov [#allocation7]   ;;  %s25_s12 = sshll.u32 %s1099_s0, 4  ;;  %s26_s12 = int_to_ptr.hbm [resolvable:$true] %s25_s12 }
   0x6   :  { %s46_s9 = sshll.u32 %s898_s30, 4  ;;  %s899_s13 = smov 128   ;;  %s47_s9 = int_to_ptr.vmem [resolvable:$true] %s46_s9 }
   0x7   :  { %s900_s14 = smov 8   ;;  %s901_s15 = smov [#allocation2]  }
   0x8   :  { %52 = dma.hbm_to_vmem [thread:$0]  %s45_s29, 512, %s47_s9, [#allocation8], %s899_s13, %s899_s13, %s900_s14  }
   0x9   :  { %28 = dma.hbm_to_smem %s26_s12, 16, %s901_s15, [#allocation5]  }
   0xa   :  { %s34_s17 = sshll.u32 %s1100_s1, 4  ;;  %s902_s18 = smov [#allocation6]   ;;  %s35_s17 = int_to_ptr.hbm [resolvable:$true] %s34_s17 }
   0xb   :  { %s36_s19 = sshll.u32 %s902_s18, 4  ;;  %s57_s0 = sshll.u32 %s1102_s3, 4  ;;  %s37_s19 = int_to_ptr.vmem [resolvable:$true] %s36_s19  ;;  %s58_s0 = int_to_ptr.hbm [resolvable:$true] %s57_s0 }
   0xc   :  { %39 = dma.hbm_to_vmem [thread:$0]  %s35_s17, 64, %s37_s19, [#allocation3]  }
   0xd   :  { %s903_s22 = smov [#allocation9]   ;;  %s72_s26 = sshll.u32 %s1104_s5, 4  ;;  %s73_s26 = int_to_ptr.hbm [resolvable:$true] %s72_s26 }
   0xe   :  { %s59_s23 = sshll.u32 %s903_s22, 4  ;;  %s904_s1 = smov [#allocation10]   ;;  %s60_s23 = int_to_ptr.vmem [resolvable:$true] %s59_s23 }
   0xf   :  { %65 = dma.hbm_to_vmem [thread:$0]  %s58_s0, 512, %s60_s23, [#allocation8], %s899_s13, %s899_s13, %s900_s14  }
  0x10   :  { %s74_s27 = sshll.u32 %s904_s1, 4  ;;  %s75_s27 = int_to_ptr.vmem [resolvable:$true] %s74_s27 }
  0x11   :  { %80 = dma.hbm_to_vmem [thread:$0]  %s73_s26, 512, %s75_s27, [#allocation11], %s899_s13, %s899_s13, %s900_s14  }
  0x12   :  { %886 = dma.done.wait [#allocation5], 16  }
  0x13   :  { %887 = vsyncadd [#allocation5], 4294967280 }
  0x14   :  { %888 = dma.done.wait [#allocation3], 64  }
  0x15   :  { %889 = vsyncadd [#allocation3], 4294967232 }
  0x16   :  { %890 = dma.done.wait [#allocation8], 1024  }
  0x17   :  { %891 = vsyncadd [#allocation8], 4294966272 }
  0x18   :  { %892 = dma.done.wait [#allocation11], 512  }
  0x19   :  { %893 = vsyncadd [#allocation11], 4294966784 }
  0x1a   :  { %103 = sfence }
  0x1b   :  { %v976_v0 = vld [vmem:[#allocation9 + $0x18] sm:$0xff]  ;;  %v978_v1 = vld [vmem:[#allocation9 + $0x10] sm:$0xff]  ;;  %v982_v2 = vld [vmem:[#allocation9 + $0x8] sm:$0xff]  ;;  %vm137_vm0 = vcmask 261120   ;;  %s656_s3 = sld [smem:[#allocation2 + $0x1]]  ;;  %vm131_vm1 = vcmask 1040384  }
  0x1c   :  { %153 = vmatpush.msra.mxu1 %v976_v0  ;;  %256 = vmatpush.msra.mxu2 %v976_v0  ;;  %v987_v3 = vld [vmem:[#allocation9] sm:$0xff]  ;;  %v109_v4 = vld [vmem:[#allocation6] sm:$0xf]  ;;  %s657_s5 = sld [smem:[#allocation2 + $0x2]]  ;;  %vm133_vm2 = vcmask 1041408   ;;  %vm135_vm3 = vcmask 1042432  }
  0x1d   :  { %306 = vmatpush.msra.mxu3 %v976_v0  ;;  %s110_s28 = sld [smem:[#allocation2]]  ;;  %v1019_v15 = vld [vmem:[%s1103_s4] ss:$0 sm:$0xff]  ;;  %v1025_v21 = vld [vmem:[#allocation10 + $0x10] sm:$0xff]  ;;  %v534_v22 = vld [vmem:[#allocation10 + $0x8] sm:$0xff]  ;;  %vm528_vm4 = vcmask 1043456  }
  0x1e   :  { %154 = vmatpush.msra.mxu1 %v978_v1  ;;  %257 = vmatpush.msra.mxu2 %v978_v1  ;;  %s658_s29 = sld [smem:[#allocation2 + $0x3]]  ;;  %v1023_v20 = vld [vmem:[#allocation10 + $0x18] sm:$0xff]  ;;  %v533_v23 = vld [vmem:[#allocation10] sm:$0xff]  ;;  %vm517_vm5 = vcmask 257024  }
  0x1f   :  { %307 = vmatpush.msra.mxu3 %v978_v1  ;;  %s661_s16 = sld [smem:[#allocation2 + $0x5]]  ;;  %565 = vmatpush.msra.mxu0 %v1023_v20  ;;  %v1044_v47 = vld [vmem:[%s1105_s6] ss:$0 sm:$0xff] }
  0x20   :  { %155 = vmatpush.msra.mxu1 %v982_v2  ;;  %258 = vmatpush.msra.mxu2 %v982_v2  ;;  %s662_s2 = sld [smem:[#allocation2 + $0x6]] }
  0x21   :  { %308 = vmatpush.msra.mxu3 %v982_v2  ;;  %s114_s30 = scalar_lea.vmem [#allocation7], %s656_s3  ;;  %566 = vmatpush.msra.mxu0 %v1025_v21  ;;  %s660_s4 = sld [smem:[#allocation2 + $0x4]] }
  0x22   :  { %156 = vmatpush.msra.mxu1 %v987_v3  ;;  %259 = vmatpush.msra.mxu2 %v987_v3  ;;  %v115_v5 = vld [vmem:[%s114_s30] sm:$0x1]  ;;  %s117_s9 = scalar_lea.vmem [#allocation7], %s657_s5  ;;  %s663_s17 = sld [smem:[#allocation2 + $0x7]] }
  0x23   :  { %659 = vmatmul.msk.f32.vlgmr.msra.gmra.mxu1 %vm137_vm0, %v109_v4  ;;  %309 = vmatpush.msra.mxu3 %v987_v3  ;;  %v118_v6 = vld [vmem:[%s117_s9] sm:$0x1]  ;;  %v123_v7 = vrot.slane %v115_v5, 7  ;;  %s111_s10 = scalar_lea.vmem [#allocation7], %s110_s28  ;;  %s666_s0 = sld [smem:[#allocation2 + $0x9]] }
  0x24   :  { %206 = vmatpush.msrb.mxu1 %v976_v0  ;;  %356 = vmatpush.msrb.mxu2 %v976_v0  ;;  %v112_v8 = vld [vmem:[%s111_s10] sm:$0x1]  ;;  %s120_s11 = scalar_lea.vmem [#allocation7], %s658_s29  ;;  %v126_v10 = vrot.slane %v118_v6, 6  ;;  %s667_s22 = sld [smem:[#allocation2 + $0xa]] }
  0x25   :  { %506 = vmatpush.msrb.mxu3 %v976_v0  ;;  %v121_v9 = vld [vmem:[%s120_s11] sm:$0x1]  ;;  %v132_v11 = vsel %vm131_vm1, %v112_v8, %v123_v7  ;;  %567 = vmatpush.msra.mxu0 %v534_v22  ;;  %s171_s18 = scalar_lea.vmem [#allocation7], %s661_s16  ;;  %s665_s23 = sld [smem:[#allocation2 + $0x8]] }
  0x26   :  { %207 = vmatpush.msrb.mxu1 %v978_v1  ;;  %357 = vmatpush.msrb.mxu2 %v978_v1  ;;  %v129_v12 = vrot.slane %v121_v9, 5  ;;  %v134_v13 = vsel %vm133_vm2, %v132_v11, %v126_v10  ;;  %v172_v24 = vld [vmem:[%s171_s18] sm:$0x1]  ;;  %s174_s19 = scalar_lea.vmem [#allocation7], %s662_s2  ;;  %s668_s24 = sld [smem:[#allocation2 + $0xb]] }
  0x27   :  { %507 = vmatpush.msrb.mxu3 %v978_v1  ;;  %568 = vmatpush.msra.mxu0 %v533_v23  ;;  %v175_v25 = vld [vmem:[%s174_s19] sm:$0x1]  ;;  %v180_v26 = vrot.slane %v172_v24, 7  ;;  %s168_s20 = scalar_lea.vmem [#allocation7], %s660_s4  ;;  %s671_s6 = sld [smem:[#allocation2 + $0xd]] }
  0x28   :  { %208 = vmatpush.msrb.mxu1 %v982_v2  ;;  %358 = vmatpush.msrb.mxu2 %v982_v2  ;;  %v136_v14 = vsel %vm135_vm3, %v134_v13, %v129_v12  ;;  %v169_v27 = vld [vmem:[%s168_s20] sm:$0x1]  ;;  %s177_s21 = scalar_lea.vmem [#allocation7], %s663_s17  ;;  %v183_v29 = vrot.slane %v175_v25, 6  ;;  %s672_s28 = sld [smem:[#allocation2 + $0xe]] }
  0x29   :  { %508 = vmatpush.msrb.mxu3 %v982_v2  ;;  %v178_v28 = vld [vmem:[%s177_s21] sm:$0x1]  ;;  %v188_v30 = vsel %vm131_vm1, %v169_v27, %v180_v26  ;;  %s221_s25 = scalar_lea.vmem [#allocation7], %s666_s0  ;;  %s670_s29 = sld [smem:[#allocation2 + $0xc]] }
  0x2a   :  { %209 = vmatpush.msrb.mxu1 %v987_v3  ;;  %359 = vmatpush.msrb.mxu2 %v987_v3  ;;  %v186_v31 = vrot.slane %v178_v28, 5  ;;  %v189_v32 = vsel %vm133_vm2, %v188_v30, %v183_v29  ;;  %v222_v40 = vld [vmem:[%s221_s25] sm:$0x1]  ;;  %s224_s26 = scalar_lea.vmem [#allocation7], %s667_s22  ;;  %s673_s30 = sld [smem:[#allocation2 + $0xf]] }
  0x2b   :  { %509 = vmatpush.msrb.mxu3 %v987_v3  ;;  %v225_v41 = vld [vmem:[%s224_s26] sm:$0x1]  ;;  %v230_v42 = vrot.slane %v222_v40, 7  ;;  %s218_s1 = scalar_lea.vmem [#allocation7], %s665_s23  ;;  %s676_s15 = sld [smem:[#allocation2 + $0x11]] }
  0x2c   :  { %406 = vmatpush.msra.mxu1 %v976_v0  ;;  %v190_v33 = vsel %vm135_vm3, %v189_v32, %v186_v31  ;;  %v219_v43 = vld [vmem:[%s218_s1] sm:$0x1]  ;;  %s227_s27 = scalar_lea.vmem [#allocation7], %s668_s24  ;;  %v233_v45 = vrot.slane %v225_v41, 6  ;;  %s677_s16 = sld [smem:[#allocation2 + $0x12]] }
  0x2d   :  { %v228_v44 = vld [vmem:[%s227_s27] sm:$0x1]  ;;  %v238_v46 = vsel %vm131_vm1, %v219_v43, %v230_v42  ;;  %s271_s9 = scalar_lea.vmem [#allocation7], %s671_s6  ;;  %s675_s2 = sld [smem:[#allocation2 + $0x10]] }
  0x2e   :  { %407 = vmatpush.msra.mxu1 %v978_v1  ;;  %v236_v48 = vrot.slane %v228_v44, 5  ;;  %v239_v49 = vsel %vm133_vm2, %v238_v46, %v233_v45  ;;  %v272_v57 = vld [vmem:[%s271_s9] sm:$0x1]  ;;  %s274_s10 = scalar_lea.vmem [#allocation7], %s672_s28  ;;  %s678_s4 = sld [smem:[#allocation2 + $0x13]] }
  0x2f   :  { %v275_v58 = vld [vmem:[%s274_s10] sm:$0x1]  ;;  %v280_v59 = vrot.slane %v272_v57, 7  ;;  %s268_s11 = scalar_lea.vmem [#allocation7], %s670_s29  ;;  %s681_s21 = sld [smem:[#allocation2 + $0x15]] }
  0x30   :  { %408 = vmatpush.msra.mxu1 %v982_v2  ;;  %v240_v52 = vsel %vm135_vm3, %v239_v49, %v236_v48  ;;  %v269_v60 = vld [vmem:[%s268_s11] sm:$0x1]  ;;  %s277_s12 = scalar_lea.vmem [#allocation7], %s673_s30  ;;  %v283_v62 = vrot.slane %v275_v58, 6  ;;  %s682_s0 = sld [smem:[#allocation2 + $0x16]] }
  0x31   :  { %v278_v61 = vld [vmem:[%s277_s12] sm:$0x1]  ;;  %v288_v63 = vsel %vm131_vm1, %v269_v60, %v280_v59  ;;  %s321_s17 = scalar_lea.vmem [#allocation7], %s676_s15  ;;  %s680_s22 = sld [smem:[#allocation2 + $0x14]] }
  0x32   :  { %409 = vmatpush.msra.mxu1 %v987_v3  ;;  %v322_v9 = vld [vmem:[%s321_s17] sm:$0x1]  ;;  %s324_s18 = scalar_lea.vmem [#allocation7], %s677_s16  ;;  %s683_s23 = sld [smem:[#allocation2 + $0x17]] }
  0x33   :  { %v325_v10 = vld [vmem:[%s324_s18] sm:$0x1]  ;;  %v330_v11 = vrot.slane %v322_v9, 7  ;;  %s318_s19 = scalar_lea.vmem [#allocation7], %s675_s2  ;;  %s686_s27 = sld [smem:[#allocation2 + $0x19]] }
  0x34   :  { %v319_v12 = vld [vmem:[%s318_s19] sm:$0x1]  ;;  %s327_s20 = scalar_lea.vmem [#allocation7], %s678_s4  ;;  %s687_s3 = sld [smem:[#allocation2 + $0x1a]] }
  0x35   :  { %v328_v13 = vld [vmem:[%s327_s20] sm:$0x1]  ;;  %s371_s24 = scalar_lea.vmem [#allocation7], %s681_s21  ;;  %s685_s5 = sld [smem:[#allocation2 + $0x18]] }
  0x36   :  { %v372_v26 = vld [vmem:[%s371_s24] sm:$0x1]  ;;  %s374_s25 = scalar_lea.vmem [#allocation7], %s682_s0  ;;  %s688_s6 = sld [smem:[#allocation2 + $0x1b]] }
  0x37   :  { %v375_v27 = vld [vmem:[%s374_s25] sm:$0x1]  ;;  %v380_v28 = vrot.slane %v372_v26, 7  ;;  %s368_s26 = scalar_lea.vmem [#allocation7], %s680_s22  ;;  %s691_s10 = sld [smem:[#allocation2 + $0x1d]] }
  0x38   :  { %v369_v29 = vld [vmem:[%s368_s26] sm:$0x1]  ;;  %s377_s1 = scalar_lea.vmem [#allocation7], %s683_s23  ;;  %v383_v31 = vrot.slane %v375_v27, 6  ;;  %s692_s11 = sld [smem:[#allocation2 + $0x1e]] }
  0x39   :  { %v378_v30 = vld [vmem:[%s377_s1] sm:$0x1]  ;;  %v388_v32 = vsel %vm131_vm1, %v369_v29, %v380_v28  ;;  %s421_s28 = scalar_lea.vmem [#allocation7], %s686_s27  ;;  %s690_s12 = sld [smem:[#allocation2 + $0x1c]] }
  0x3a   :  { %v422_v42 = vld [vmem:[%s421_s28] sm:$0x1]  ;;  %s424_s29 = scalar_lea.vmem [#allocation7], %s687_s3  ;;  %s693_s15 = sld [smem:[#allocation2 + $0x1f]] }
  0x3b   :  { %v425_v43 = vld [vmem:[%s424_s29] sm:$0x1]  ;;  %v430_v44 = vrot.slane %v422_v42, 7  ;;  %s418_s30 = scalar_lea.vmem [#allocation7], %s685_s5  ;;  %s905_s18 = smov [#allocation13]  }
  0x3c   :  { %v419_v45 = vld [vmem:[%s418_s30] sm:$0x1]  ;;  %s427_s9 = scalar_lea.vmem [#allocation7], %s688_s6  ;;  %v433_v48 = vrot.slane %v425_v43, 6  ;;  %s604_s19 = sshll.u32 %s905_s18, 4  ;;  %s605_s19 = int_to_ptr.vmem [resolvable:$true] %s604_s19 }
  0x3d   :  { %v428_v46 = vld [vmem:[%s427_s9] sm:$0x1]  ;;  %v438_v49 = vsel %vm131_vm1, %v419_v45, %v430_v44  ;;  %s471_s16 = scalar_lea.vmem [#allocation7], %s691_s10  ;;  %s606_s0 = sshll.u32 %s1107_s8, 4  ;;  %s607_s0 = int_to_ptr.hbm [resolvable:$true] %s606_s0 }
  0x3e   :  { %v472_v59 = vld [vmem:[%s471_s16] sm:$0x1]  ;;  %s474_s2 = scalar_lea.vmem [#allocation7], %s692_s11  ;;  %s906_s22 = smov [#allocation12]  }
  0x3f   :  { %v475_v60 = vld [vmem:[%s474_s2] sm:$0x1]  ;;  %s468_s4 = scalar_lea.vmem [#allocation7], %s690_s12  ;;  %s590_s23 = sshll.u32 %s906_s22, 4  ;;  %s591_s23 = int_to_ptr.vmem [resolvable:$true] %s590_s23 }
  0x40   :  { %s477_s17 = scalar_lea.vmem [#allocation7], %s693_s15  ;;  %s592_s26 = sshll.u32 %s1106_s7, 4  ;;  %s593_s26 = int_to_ptr.hbm [resolvable:$true] %s592_s26 }
  0xa0   :  { %v158_v16 = vpop.f32.mrf.mxu1 }
  0xa1   :  { %v161_v17 = vadd.f32 %v158_v16, %v136_v14  ;;  %v333_v14 = vrot.slane %v325_v10, 6  ;;  %v338_v16 = vsel %vm131_vm1, %v319_v12, %v330_v11 }
  0xa3   :  { %v165_v18 = vadd.f32 %v1019_v15, %v161_v17  ;;  %v336_v17 = vrot.slane %v328_v13, 5 }
  0xa5   :  { %714 = vtanh.f32 %v165_v18  ;;  %v339_v18 = vsel %vm133_vm2, %v338_v16, %v333_v14 }
  0xab   :  { %v715_v19 = vpop.eup %714 }
  0xac   :  { %664 = vmatmul.msk.f32.vlgmr.msrb.gmra.mxu1 %vm137_vm0, %v715_v19 }
 0x129   :  { %v211_v34 = vpop.f32.mrf.mxu1 }
 0x12a   :  { %v214_v35 = vadd.f32 %v211_v34, %v190_v33  ;;  %v386_v33 = vrot.slane %v378_v30, 5  ;;  %v389_v34 = vsel %vm133_vm2, %v388_v32, %v383_v31 }
 0x12c   :  { %v215_v36 = vadd.f32 %v1019_v15, %v214_v35  ;;  %v390_v35 = vsel %vm135_vm3, %v389_v34, %v386_v33 }
 0x12e   :  { %716 = vtanh.f32 %v215_v36 }
 0x134   :  { %v717_v37 = vpop.eup %716 }
 0x135   :  { %669 = vmatmul.msk.f32.vlgmr.msra.gmra.mxu2 %vm137_vm0, %v717_v37  ;;  %v519_v38 = vrot.slane %v717_v37, 4 }
 0x136   :  { %456 = vmatpush.msra.mxu2 %v976_v0  ;;  %v286_v0 = vrot.slane %v278_v61, 5  ;;  %v480_v61 = vrot.slane %v472_v59, 7 }
 0x137   :  { %v529_v39 = vsel %vm528_vm4, %v715_v19, %v519_v38 }
 0x138   :  { %695 = vmatmul.msk.f32.vlgmr.msra.gmra.mxu0 %vm137_vm0, %v529_v39  ;;  %457 = vmatpush.msra.mxu2 %v978_v1  ;;  %v289_v1 = vsel %vm133_vm2, %v288_v63, %v283_v62  ;;  %v469_v62 = vld [vmem:[%s468_s4] sm:$0x1] }
 0x139   :  { %v478_v63 = vld [vmem:[%s477_s17] sm:$0x1] }
 0x13a   :  { %458 = vmatpush.msra.mxu2 %v982_v2  ;;  %v290_v2 = vsel %vm135_vm3, %v289_v1, %v286_v0  ;;  %v483_v0 = vrot.slane %v475_v60, 6  ;;  %v488_v1 = vsel %vm131_vm1, %v469_v62, %v480_v61 }
 0x13c   :  { %459 = vmatpush.msra.mxu2 %v987_v3 }
 0x1b5   :  { %v570_v50 = vpop.f32.mrf.mxu0 }
 0x1b6   :  { %v571_v51 = vadd.f32 %v1044_v47, %v570_v50  ;;  %v436_v50 = vrot.slane %v428_v46, 5 }
 0x1b8   :  { %582 = vst.msk [vmem:[#allocation12] sm:$0xff] %vm137_vm0, %v571_v51  ;;  %v261_v53 = vpop.f32.mrf.mxu2  ;;  %v439_v51 = vsel %vm133_vm2, %v438_v49, %v433_v48 }
 0x1b9   :  { %v264_v54 = vadd.f32 %v261_v53, %v240_v52 }
 0x1bb   :  { %v265_v55 = vadd.f32 %v1019_v15, %v264_v54  ;;  %v440_v54 = vsel %vm135_vm3, %v439_v51, %v436_v50 }
 0x1bd   :  { %718 = vtanh.f32 %v265_v55 }
 0x1c3   :  { %v719_v56 = vpop.eup %718 }
 0x1c4   :  { %674 = vmatmul.msk.f32.vlgmr.msra.gmra.mxu3 %vm137_vm0, %v719_v56 }
 0x1c5   :  { %699 = vmatpush.msra.mxu3 %v1023_v20 }
 0x1c7   :  { %700 = vmatpush.msra.mxu3 %v1025_v21  ;;  %v340_v21 = vsel %vm135_vm3, %v339_v18, %v336_v17 }
 0x1c9   :  { %701 = vmatpush.msra.mxu3 %v534_v22 }
 0x1cb   :  { %702 = vmatpush.msra.mxu3 %v533_v23 }
 0x247   :  { %v311_v3 = vpop.f32.mrf.mxu3 }
 0x248   :  { %v314_v4 = vadd.f32 %v311_v3, %v290_v2  ;;  %v486_v2 = vrot.slane %v478_v63, 5  ;;  %v489_v3 = vsel %vm133_vm2, %v488_v1, %v483_v0 }
 0x24a   :  { %v315_v5 = vadd.f32 %v1019_v15, %v314_v4  ;;  %v490_v4 = vsel %vm135_vm3, %v489_v3, %v486_v2 }
 0x24c   :  { %720 = vtanh.f32 %v315_v5 }
 0x252   :  { %v721_v6 = vpop.eup %720 }
 0x253   :  { %679 = vmatmul.msk.f32.vlgmr.msrb.gmra.mxu2 %vm137_vm0, %v721_v6  ;;  %v521_v7 = vrot.slane %v721_v6, 4 }
 0x255   :  { %v530_v8 = vsel %vm528_vm4, %v719_v56, %v521_v7 }
 0x256   :  { %696 = vmatmul.msk.f32.gmra.mxu0 %vm137_vm0, %v530_v8 }
 0x2d3   :  { %v573_v19 = vpop.f32.mrf.mxu0 }
 0x2d4   :  { %v574_v20 = vadd.f32 %v1044_v47, %v573_v19 }
 0x2d6   :  { %583 = vst.msk [vmem:[#allocation12 + $0x8] sm:$0xff] %vm137_vm0, %v574_v20  ;;  %v361_v22 = vpop.f32.mrf.mxu2 }
 0x2d7   :  { %v364_v23 = vadd.f32 %v361_v22, %v340_v21 }
 0x2d9   :  { %v365_v24 = vadd.f32 %v1019_v15, %v364_v23 }
 0x2db   :  { %722 = vtanh.f32 %v365_v24 }
 0x2e1   :  { %v723_v25 = vpop.eup %722 }
 0x2e2   :  { %684 = vmatmul.msk.f32.vlgmr.msra.gmra.mxu1 %vm137_vm0, %v723_v25 }
 0x35f   :  { %v411_v36 = vpop.f32.mrf.mxu1 }
 0x360   :  { %v414_v37 = vadd.f32 %v411_v36, %v390_v35 }
 0x362   :  { %v415_v38 = vadd.f32 %v1019_v15, %v414_v37 }
 0x364   :  { %724 = vtanh.f32 %v415_v38 }
 0x36a   :  { %v725_v39 = vpop.eup %724 }
 0x36b   :  { %689 = vmatmul.msk.f32.vlgmr.msra.gmra.mxu2 %vm137_vm0, %v725_v39  ;;  %v523_v40 = vrot.slane %v725_v39, 4 }
 0x36d   :  { %v531_v41 = vsel %vm528_vm4, %v723_v25, %v523_v40 }
 0x36e   :  { %697 = vmatmul.msk.f32.gmra.mxu0 %vm137_vm0, %v531_v41 }
 0x3eb   :  { %v576_v52 = vpop.f32.mrf.mxu0 }
 0x3ec   :  { %v577_v53 = vadd.f32 %v1044_v47, %v576_v52 }
 0x3ee   :  { %584 = vst.msk [vmem:[#allocation12 + $0x10] sm:$0xff] %vm137_vm0, %v577_v53  ;;  %v461_v55 = vpop.f32.mrf.mxu2 }
 0x3ef   :  { %v464_v56 = vadd.f32 %v461_v55, %v440_v54 }
 0x3f1   :  { %v465_v57 = vadd.f32 %v1019_v15, %v464_v56 }
 0x3f3   :  { %726 = vtanh.f32 %v465_v57 }
 0x3f9   :  { %v727_v58 = vpop.eup %726 }
 0x3fa   :  { %694 = vmatmul.msk.f32.vlgmr.msrb.gmra.mxu3 %vm137_vm0, %v727_v58 }
 0x47d   :  { %v511_v5 = vpop.f32.mrf.mxu3 }
 0x47e   :  { %v514_v6 = vadd.f32 %v511_v5, %v490_v4 }
 0x480   :  { %v515_v7 = vadd.f32 %v1019_v15, %v514_v6 }
 0x482   :  { %728 = vtanh.f32 %v515_v7 }
 0x488   :  { %v729_v8 = vpop.eup %728 }
 0x489   :  { %v526_v9 = vrot.slane %v729_v8, 4  ;;  %518 = vst.msk [vmem:[#allocation13] sm:$0xf] %vm517_vm5, %v729_v8 }
 0x48a   :  { %609 = dma.vmem_to_hbm [thread:$0]  %s605_s19, 64, %s607_s0, [#allocation14]  }
 0x48b   :  { %v532_v10 = vsel %vm528_vm4, %v727_v58, %v526_v9 }
 0x48c   :  { %698 = vmatmul.msk.f32.vlgmr.msra.gmra.mxu3 %vm137_vm0, %v532_v10 }
 0x50f   :  { %v579_v15 = vpop.f32.mrf.mxu3 }
 0x510   :  { %v580_v11 = vadd.f32 %v1044_v47, %v579_v15 }
 0x512   :  { %585 = vst.msk [vmem:[#allocation12 + $0x18] sm:$0xff] %vm137_vm0, %v580_v11 }
 0x513   :  { %598 = dma.vmem_to_hbm [thread:$0]  %s591_s23, 512, %s593_s26, [#allocation4], %s899_s13, %s899_s13, %s900_s14  }
 0x514   :  { %894 = dma.done.wait [#allocation4], 512  }
 0x515   :  { %895 = vsyncadd [#allocation4], 4294966784 }
 0x516   :  { %896 = dma.done.wait [#allocation14], 64  }
 0x517   :  { %897 = vsyncadd [#allocation14], 4294967232 }
 0x518   :  { %618 = vsyncpa [#allocation3], 1 }
 0x519   :  { %619 = vsyncpa [#allocation8], 1 }
 0x51a   :  { %620 = vsyncpa [#allocation11], 1 }
 0x51b   :  { %621 = vsyncpa [#allocation4], 1 }
 0x51c   :  { %622 = vsyncpa [#allocation14], 1 }
 0x51d   :  { %623 = vsyncpa [#allocation5], 1 }

</bundles_post_ra>
